<compile_context>
chip_gen: v7x
topology: tpu7x:2x2x1
jax: 0.10.0
libtpu: 0.0.40
codegen_flags: <defaults>
</compile_context>

<pallas_src>
import math

import jax
import jax.numpy as jnp
from jax.experimental import pallas as pl
from jax.experimental.pallas import tpu as pltpu


# ----------------------------------------------------------------------------
# Sinusoid table (identical semantics to the torch __init__)
# ----------------------------------------------------------------------------

def generate_encoding(d_model: int, max_len: int = 512) -> jnp.ndarray:
    if d_model % 2 != 0:
        # The PyTorch original also fails (shape mismatch) for odd d_model.
        raise ValueError("d_model must be even for sinusoidal positional encoding")
    position = jnp.arange(0, max_len, dtype=jnp.float32)[:, None]            # (L, 1)
    div_term = jnp.exp(
        jnp.arange(0, d_model, 2, dtype=jnp.float32) * (-math.log(10000.0) / d_model)
    )                                                                         # (D/2,)
    enc = jnp.zeros((max_len, d_model), dtype=jnp.float32)
    enc = enc.at[:, 0::2].set(jnp.sin(position * div_term))
    enc = enc.at[:, 1::2].set(jnp.cos(position * div_term))
    return enc


# ----------------------------------------------------------------------------
# Kernels
# ----------------------------------------------------------------------------

def _pe_add_kernel_3d(x_ref, enc_ref, o_ref):
    # x_ref/o_ref: (TB, TS, D) block; enc_ref: (TS, D) broadcast over batch.
    o_ref[...] = (x_ref[...] + enc_ref[...]).astype(o_ref.dtype)


def _pe_add_kernel_2d(x_ref, enc_ref, o_ref):
    # Lane-dense flattened layout: x_ref/o_ref: (TB, TF); enc_ref: (1, TF).
    o_ref[...] = (x_ref[...] + enc_ref[...]).astype(o_ref.dtype)


# ----------------------------------------------------------------------------
# Block sizing / helpers
# ----------------------------------------------------------------------------

_TARGET_BLOCK_BYTES = 4 * 1024 * 1024   # ~4 MiB/block: ~20 MiB live with
                                        # double-buffered x/out + single enc.
_VMEM_LIMIT_BYTES = 32 * 1024 * 1024    # explicit (v5e default is only 16 MiB);
                                        # leaves headroom on v7x's 64 MiB physical.


def _sublane_multiple(itemsize: int) -> int:
    # f32 -> 8, bf16 -> 16, int8/fp8 -> 32 (sub-32-bit dtypes pack along sublanes).
    return max(8, 32 // itemsize)


def _enc_block_spec(block_shape, index_map, single_buffer: bool):
    """Encoding-stream BlockSpec; single-buffered when the API supports it."""
    if single_buffer and hasattr(pl, "Buffered"):
        try:
            return pl.BlockSpec(block_shape, index_map, pipeline_mode=pl.Buffered(1))
        except TypeError:  # older BlockSpec signature without pipeline_mode
            pass
    return pl.BlockSpec(block_shape, index_map)


def _call_with_enc_fallback(make_call, *operands):
    """Run with the single-buffered enc spec; retry plain if lowering rejects it."""
    try:
        return make_call(True)(*operands)
    except Exception:  # fall back to the well-supported double-buffered config
        return make_call(False)(*operands)


def _cost_estimate(B, S, D, itemsize):
    return pl.CostEstimate(
        flops=B * S * D,
        transcendentals=0,
        bytes_accessed=(2 * B * S * D + S * D) * itemsize,
    )


def _choose_tiled_blocks(B, S, D, itemsize):
    """(TB, TS) for (TB, TS, D) blocks; TS is always a multiple of the sublane
    packing so the enc block stays layout-legal regardless of max_len/S."""
    sub = _sublane_multiple(itemsize)
    row_bytes = D * itemsize
    budget_rows = max(sub, (_TARGET_BLOCK_BYTES // row_bytes) // sub * sub)
    s_padded = ((S + sub - 1) // sub) * sub      # S rounded up to sublane packing
    if s_padded <= budget_rows:
        TS = s_padded                            # whole sequence per block
        TB = max(1, min(B, budget_rows // TS))   # fold batch rows into the block
    else:
        TS = budget_rows
        TB = 1
    return TB, TS


def _choose_flat_blocks(B, F, itemsize):
    """(TB, TF) for flattened (TB, TF) blocks; TB is a sublane multiple or B,
    TF is a multiple of 128 or the full F extent; block bytes <= target."""
    sub = _sublane_multiple(itemsize)
    min_tb = B if B <= sub else sub              # smallest legal batch tile
    if min_tb * F * itemsize <= _TARGET_BLOCK_BYTES:
        TF = F
        tb = _TARGET_BLOCK_BYTES // (F * itemsize)
        if tb >= B:
            TB = B
        else:
            TB = min(B, max(sub, (tb // sub) * sub))
    else:
        TB = min_tb
        tf = max(128, (_TARGET_BLOCK_BYTES // (TB * itemsize) // 128) * 128)
        TF = min(tf, F)
    return TB, TF


# ----------------------------------------------------------------------------
# Wrappers
# ----------------------------------------------------------------------------

def _pe_forward_tiled(x, encoding, donate_x):
    """Path for lane-dense D (D % 128 == 0): (TB, TS, D) blocks."""
    B, S, D = x.shape
    itemsize = jnp.dtype(x.dtype).itemsize
    TB, TS = _choose_tiled_blocks(B, S, D, itemsize)
    # s is the OUTER grid axis: the enc block index (s, 0) is constant across
    # the inner batch loop, so its DMA is not re-issued per batch block.
    grid = (pl.cdiv(S, TS), pl.cdiv(B, TB))

    def make_call(single_buffer_enc):
        return pl.pallas_call(
            _pe_add_kernel_3d,
            out_shape=jax.ShapeDtypeStruct((B, S, D), x.dtype),
            grid_spec=pltpu.PrefetchScalarGridSpec(
                num_scalar_prefetch=0,
                grid=grid,
                in_specs=[
                    pl.BlockSpec((TB, TS, D), lambda s, b: (b, s, 0)),
                    # Full table passed in; index_map picks rows (no wrapper slice copy).
                    _enc_block_spec((TS, D), lambda s, b: (s, 0), single_buffer_enc),
                ],
                out_specs=pl.BlockSpec((TB, TS, D), lambda s, b: (b, s, 0)),
            ),
            compiler_params=pltpu.CompilerParams(
                dimension_semantics=("parallel", "parallel"),
                vmem_limit_bytes=_VMEM_LIMIT_BYTES,
            ),
            cost_estimate=_cost_estimate(B, S, D, itemsize),
            input_output_aliases={0: 0} if donate_x else {},
        )

    return _call_with_enc_fallback(make_call, x, encoding)


def _pe_forward_flat(x, encoding, donate_x):
    """Path for small / non-128-multiple D: flatten (S, D) to a lane-dense axis,
    tile it in multiples of 128, and fold batch rows into each block."""
    B, S, D = x.shape
    F = S * D
    itemsize = jnp.dtype(x.dtype).itemsize
    TB, TF = _choose_flat_blocks(B, F, itemsize)
    # f is the OUTER grid axis so the enc block (0, f) is reused across batch blocks.
    grid = (pl.cdiv(F, TF), pl.cdiv(B, TB))

    # Wrapper-side layout plumbing (kept out of the kernel).
    x2 = x.reshape(B, F)
    enc2 = encoding[:S, :].reshape(1, F)

    def make_call(single_buffer_enc):
        return pl.pallas_call(
            _pe_add_kernel_2d,
            out_shape=jax.ShapeDtypeStruct((B, F), x.dtype),
            grid_spec=pltpu.PrefetchScalarGridSpec(
                num_scalar_prefetch=0,
                grid=grid,
                in_specs=[
                    pl.BlockSpec((TB, TF), lambda f, b: (b, f)),
                    _enc_block_spec((1, TF), lambda f, b: (0, f), single_buffer_enc),
                ],
                out_specs=pl.BlockSpec((TB, TF), lambda f, b: (b, f)),
            ),
            compiler_params=pltpu.CompilerParams(
                dimension_semantics=("parallel", "parallel"),
                vmem_limit_bytes=_VMEM_LIMIT_BYTES,
            ),
            cost_estimate=_cost_estimate(B, S, D, itemsize),
            input_output_aliases={0: 0} if donate_x else {},
        )

    out2 = _call_with_enc_fallback(make_call, x2, enc2)
    return out2.reshape(B, S, D)


def positional_encoding_forward(x, encoding, *, donate_x: bool = False):
    """x: (B, S, D); encoding: (max_len, D) with max_len >= S. Returns x + encoding[:S]."""
    B, S, D = x.shape
    assert encoding.shape[1] == D and encoding.shape[0] >= S
    # Cast the table once in the wrapper so the kernel adds in x's native dtype
    # (halves enc HBM traffic / VMEM when x is bf16).
    if encoding.dtype != x.dtype:
        encoding = encoding.astype(x.dtype)
    if D % 128 == 0:
        return _pe_forward_tiled(x, encoding, donate_x)
    return _pe_forward_flat(x, encoding, donate_x)


if __name__ == "__main__":
    key0, key1, key2 = jax.random.split(jax.random.PRNGKey(0), 3)

    # 1) Flat lane-dense path: batch=2, seq=8, d_model=32 (D % 128 != 0).
    B, S, D = 2, 8, 32
    MAX_LEN = 512
    enc = generate_encoding(D, MAX_LEN)
    x = jax.random.normal(key0, (B, S, D), dtype=jnp.float32)
    out = jax.block_until_ready(positional_encoding_forward(x, enc))
    ref = x + enc[:S, :]
    assert out.shape == (B, S, D)
    assert jnp.allclose(out, ref, atol=1e-6, rtol=1e-6), "mismatch (flat path)"

    # 2) Tiled path (D a multiple of 128), f32, batch folded into the block.
    B2, S2, D2 = 2, 64, 128
    enc2 = generate_encoding(D2, 128)
    x2 = jax.random.normal(key1, (B2, S2, D2), dtype=jnp.float32)
    out2 = jax.block_until_ready(positional_encoding_forward(x2, enc2))
    ref2 = x2 + enc2[:S2, :]
    assert jnp.allclose(out2, ref2, atol=1e-6, rtol=1e-6), "mismatch (tiled path)"

    # 3) Tiled path with bf16 input: exercises wrapper-side table cast and
    #    16-row sublane rounding (S=24 -> TS=32 partial edge block).
    B3, S3, D3 = 4, 24, 128
    enc3 = generate_encoding(D3, 64)
    x3 = jax.random.normal(key2, (B3, S3, D3), dtype=jnp.bfloat16)
    out3 = jax.block_until_ready(positional_encoding_forward(x3, enc3))
    ref3 = x3 + enc3[:S3, :].astype(jnp.bfloat16)
    assert jnp.allclose(out3.astype(jnp.float32), ref3.astype(jnp.float32),
                        atol=1e-2, rtol=1e-2), "mismatch (tiled bf16 path)"

    print("KERNEL_OK")
</pallas_src>

<mosaic_0001>
module attributes {stable_mosaic.version = 11 : i64} {
  func.func @_pe_add_kernel_2d(%arg0: i32, %arg1: i32, %arg2: memref<2x256xf32, #tpu.memory_space<vmem>>, %arg3: memref<1x256xf32, #tpu.memory_space<vmem>>, %arg4: memref<2x256xf32, #tpu.memory_space<vmem>>) attributes {dimension_semantics = [#tpu.dimension_semantics<parallel>, #tpu.dimension_semantics<parallel>], iteration_bounds = array<i64: 1, 1>, scalar_prefetch = 0 : i64, scratch_operands = 0 : i64, tpu.core_type = #tpu.core_type<tc>, window_params = [{transform_indices = @transform_0, window_bounds = array<i64: 2, 256>}, {pipeline_mode = #tpu.pipeline_mode<synchronous>, transform_indices = @transform_1, window_bounds = array<i64: 1, 256>}, {transform_indices = @transform_2, window_bounds = array<i64: 2, 256>}]} {
    %c0 = arith.constant 0 : index
    %c0_0 = arith.constant 0 : index
    %0 = vector.load %arg2[%c0, %c0_0] : memref<2x256xf32, #tpu.memory_space<vmem>>, vector<2x256xf32>
    %c0_1 = arith.constant 0 : index
    %c0_2 = arith.constant 0 : index
    %1 = vector.load %arg3[%c0_1, %c0_2] : memref<1x256xf32, #tpu.memory_space<vmem>>, vector<1x256xf32>
    %2 = vector.broadcast %1 : vector<1x256xf32> to vector<2x256xf32>
    %3 = arith.addf %0, %2 : vector<2x256xf32>
    %c0_3 = arith.constant 0 : index
    %c0_4 = arith.constant 0 : index
    %4 = vector.load %arg4[%c0_3, %c0_4] : memref<2x256xf32, #tpu.memory_space<vmem>>, vector<2x256xf32>
    tpu.vector_store %arg4[%c0_3, %c0_4], %3 {strides = array<i32>} : memref<2x256xf32, #tpu.memory_space<vmem>>, vector<2x256xf32>,
    return
  }
  func.func @transform_0(%arg0: i32, %arg1: i32) -> (i32, i32) {
    %c0_i32 = arith.constant 0 : i32
    return %arg1, %arg0 : i32, i32
  }
  func.func @transform_1(%arg0: i32, %arg1: i32) -> (i32, i32) {
    %c0_i32 = arith.constant 0 : i32
    %c0_i32_0 = arith.constant 0 : i32
    return %c0_i32, %arg0 : i32, i32
  }
  func.func @transform_2(%arg0: i32, %arg1: i32) -> (i32, i32) {
    %c0_i32 = arith.constant 0 : i32
    return %arg1, %arg0 : i32, i32
  }
}

module attributes {stable_mosaic.version = 11 : i64} {
  func.func @_pe_add_kernel_2d(%arg0: i32, %arg1: i32, %arg2: memref<2x256xf32, #tpu.memory_space<vmem>>, %arg3: memref<1x256xf32, #tpu.memory_space<vmem>>, %arg4: memref<2x256xf32, #tpu.memory_space<vmem>>) attributes {dimension_semantics = [#tpu.dimension_semantics<parallel>, #tpu.dimension_semantics<parallel>], iteration_bounds = array<i64: 1, 1>, scalar_prefetch = 0 : i64, scratch_operands = 0 : i64, tpu.core_type = #tpu.core_type<tc>, window_params = [{transform_indices = @transform_0, window_bounds = array<i64: 2, 256>}, {transform_indices = @transform_1, window_bounds = array<i64: 1, 256>}, {transform_indices = @transform_2, window_bounds = array<i64: 2, 256>}]} {
    %c0 = arith.constant 0 : index
    %c0_0 = arith.constant 0 : index
    %0 = vector.load %arg2[%c0, %c0_0] : memref<2x256xf32, #tpu.memory_space<vmem>>, vector<2x256xf32>
    %c0_1 = arith.constant 0 : index
    %c0_2 = arith.constant 0 : index
    %1 = vector.load %arg3[%c0_1, %c0_2] : memref<1x256xf32, #tpu.memory_space<vmem>>, vector<1x256xf32>
    %2 = vector.broadcast %1 : vector<1x256xf32> to vector<2x256xf32>
    %3 = arith.addf %0, %2 : vector<2x256xf32>
    %c0_3 = arith.constant 0 : index
    %c0_4 = arith.constant 0 : index
    %4 = vector.load %arg4[%c0_3, %c0_4] : memref<2x256xf32, #tpu.memory_space<vmem>>, vector<2x256xf32>
    tpu.vector_store %arg4[%c0_3, %c0_4], %3 {strides = array<i32>} : memref<2x256xf32, #tpu.memory_space<vmem>>, vector<2x256xf32>,
    return
  }
  func.func @transform_0(%arg0: i32, %arg1: i32) -> (i32, i32) {
    %c0_i32 = arith.constant 0 : i32
    return %arg1, %arg0 : i32, i32
  }
  func.func @transform_1(%arg0: i32, %arg1: i32) -> (i32, i32) {
    %c0_i32 = arith.constant 0 : i32
    %c0_i32_0 = arith.constant 0 : i32
    return %c0_i32, %arg0 : i32, i32
  }
  func.func @transform_2(%arg0: i32, %arg1: i32) -> (i32, i32) {
    %c0_i32 = arith.constant 0 : i32
    return %arg1, %arg0 : i32, i32
  }
}

</mosaic_0001>

<bundles_post_ra>
// kernel: tpu_custom_call.1
= control target key start
LH: loop header
LB: loop body
LE: loop exit
PB: predicated region body
PF: predicated region fallthrough
CT: control target
= control target key end

     0   :  { %7 = vsyncpa [#allocation3], 0  ;;  %s157_s0 = inlined_call_operand.hbm [shape: f32[2,256], index: 0, kind: input, shape index: {}]   ;;  %s158_s1 = inlined_call_operand.vmem [shape: f32[1,256], index: 1, kind: input, shape index: {}]   ;;  %s159_s2 = inlined_call_operand.hbm [shape: f32[2,256], index: 2, kind: output, shape index: {}]  }
   0x1   :  { %8 = vsyncpa [#allocation4], 0  ;;  %s112_s9 = smov [#allocation2]   ;;  %s64_s13 = scalar_lea.hbm %s157_s0, 64 }
   0x2   :  { %s15_s10 = sshll.u32 %s112_s9, 4  ;;  %p65_p0 = scmp.ne.s32.totalorder %s157_s0, %s64_s13  ;;  %s16_s10 = int_to_ptr.vmem [resolvable:$true] %s15_s10 }
   0x3   :  { %p68_p1 = scmp.lt.u32.totalorder %s64_s13, %s157_s0 }
   0x5   :  { %p70_p2 = pnand %p68_p1, %p65_p0 }
   0x7   :  { %73 = shalt.err (!%p70_p2)
}
   0x8   :  { %s74_s18 = scalar_lea.vmem %s16_s10, 64  ;;  %p79_p4 = scmp.lt.s32.totalorder %s16_s10, %s16_s10 }
   0x9   :  { %p75_p3 = scmp.ne.s32.totalorder %s16_s10, %s74_s18  ;;  %p80_p5 = scmp.lt.s32.totalorder %s74_s18, %s74_s18 }
   0xb   :  { %p81_p6 = por %p80_p5, %p79_p4 }
   0xd   :  { %p82_p7 = pnand %p81_p6, %p75_p3 }
   0xf   :  { %85 = shalt.err (!%p82_p7)
}
  0x10   :  { %18 = dma.hbm_to_vmem [thread:$0]  %s157_s0, 64, %s16_s10, [#allocation3]  }
  0x11   :  { %108 = dma.done.wait [#allocation3], 64  }
  0x12   :  { %109 = vsyncadd [#allocation3], 4294967232  ;;  %v27_v0 = vlaneseq  ;;  %v113_v1 = vmov 1983009808   ;;  %v25_v7 = vld [vmem:[%s158_s1] sm:$0x3] }
  0x13   :  { %v37_v2 = vunpack.c.l.s4 %v113_v1  ;;  %v24_v12 = vld [vmem:[#allocation2] sm:$0xf]  ;;  %s114_s23 = smov [#allocation5]  }
  0x14   :  { %v28_v3 = vshrl.u32 %v27_v0, 7  ;;  %s52_s0 = sshll.u32 %s114_s23, 4  ;;  %s53_s0 = int_to_ptr.vmem [resolvable:$true] %s52_s0 }
  0x15   :  { %v38_v6 = vunpack.c.0.s8 %v37_v2  ;;  %s86_s24 = scalar_lea.vmem %s53_s0, 64  ;;  %p91_p9 = scmp.lt.s32.totalorder %s53_s0, %s53_s0 }
  0x16   :  { %v29_v4 = vsub.s32 0, %v28_v3  ;;  %v33_v5 = vsub.s32 1, %v28_v3  ;;  %p87_p8 = scmp.ne.s32.totalorder %s53_s0, %s86_s24  ;;  %p92_p10 = scmp.lt.s32.totalorder %s86_s24, %s86_s24 }
  0x17   :  { %v41_v10 = vsub.s32 %v38_v6, %v28_v3 }
  0x18   :  { %v30_v8 = vrot.slane %v25_v7, %v29_v4  ;;  %v34_v9 = vrot.slane %v25_v7, %v33_v5  ;;  %p93_p11 = por %p92_p10, %p91_p9 }
  0x1a   :  { %v35_v11 = vcombine.low %v30_v8, %v34_v9  ;;  %p94_p12 = pnand %p93_p11, %p87_p8 }
  0x1c   :  { %v42_v13 = vrot.slane %v35_v11, %v41_v10 }
  0x1e   :  { %v44_v14 = vadd.f32 %v42_v13, %v24_v12 }
  0x20   :  { %45 = vst [vmem:[#allocation5] sm:$0xf] %v44_v14 }
  0x21   :  { %97 = shalt.err (!%p94_p12)
}
  0x22   :  { %s98_s26 = scalar_lea.hbm %s159_s2, 64 }
  0x23   :  { %p99_p13 = scmp.ne.s32.totalorder %s159_s2, %s98_s26  ;;  %p102_p0 = scmp.lt.u32.totalorder %s98_s26, %s159_s2 }
  0x25   :  { %p104_p1 = pnand %p102_p0, %p99_p13 }
  0x27   :  { %107 = shalt.err (!%p104_p1)
}
  0x28   :  { %55 = dma.vmem_to_hbm [thread:$0]  %s53_s0, 64, %s159_s2, [#allocation4]  }
  0x29   :  { %110 = dma.done.wait [#allocation4], 64  }
  0x2a   :  { %111 = vsyncadd [#allocation4], 4294967232 }
  0x2b   :  { %59 = vsyncpa [#allocation3], 1 }
  0x2c   :  { %60 = vsyncpa [#allocation4], 1 }

// kernel: tpu_custom_call.1
= control target key start
LH: loop header
LB: loop body
LE: loop exit
PB: predicated region body
PF: predicated region fallthrough
CT: control target
= control target key end

     0   :  { %7 = vsyncpa [#allocation3], 0  ;;  %s157_s0 = inlined_call_operand.hbm [shape: f32[2,256], index: 0, kind: input, shape index: {}]   ;;  %s158_s1 = inlined_call_operand.vmem [shape: f32[1,256], index: 1, kind: input, shape index: {}]   ;;  %s159_s2 = inlined_call_operand.hbm [shape: f32[2,256], index: 2, kind: output, shape index: {}]  }
   0x1   :  { %8 = vsyncpa [#allocation4], 0  ;;  %s112_s9 = smov [#allocation2]   ;;  %s64_s13 = scalar_lea.hbm %s157_s0, 64 }
   0x2   :  { %s15_s10 = sshll.u32 %s112_s9, 4  ;;  %p65_p0 = scmp.ne.s32.totalorder %s157_s0, %s64_s13  ;;  %s16_s10 = int_to_ptr.vmem [resolvable:$true] %s15_s10 }
   0x3   :  { %p68_p1 = scmp.lt.u32.totalorder %s64_s13, %s157_s0 }
   0x5   :  { %p70_p2 = pnand %p68_p1, %p65_p0 }
   0x7   :  { %73 = shalt.err (!%p70_p2)
}
   0x8   :  { %s74_s18 = scalar_lea.vmem %s16_s10, 64  ;;  %p79_p4 = scmp.lt.s32.totalorder %s16_s10, %s16_s10 }
   0x9   :  { %p75_p3 = scmp.ne.s32.totalorder %s16_s10, %s74_s18  ;;  %p80_p5 = scmp.lt.s32.totalorder %s74_s18, %s74_s18 }
   0xb   :  { %p81_p6 = por %p80_p5, %p79_p4 }
   0xd   :  { %p82_p7 = pnand %p81_p6, %p75_p3 }
   0xf   :  { %85 = shalt.err (!%p82_p7)
}
  0x10   :  { %18 = dma.hbm_to_vmem [thread:$0]  %s157_s0, 64, %s16_s10, [#allocation3]  }
  0x11   :  { %108 = dma.done.wait [#allocation3], 64  }
  0x12   :  { %109 = vsyncadd [#allocation3], 4294967232  ;;  %v27_v0 = vlaneseq  ;;  %v113_v1 = vmov 1983009808   ;;  %v25_v7 = vld [vmem:[%s158_s1] sm:$0x3] }
  0x13   :  { %v37_v2 = vunpack.c.l.s4 %v113_v1  ;;  %v24_v12 = vld [vmem:[#allocation2] sm:$0xf]  ;;  %s114_s23 = smov [#allocation5]  }
  0x14   :  { %v28_v3 = vshrl.u32 %v27_v0, 7  ;;  %s52_s0 = sshll.u32 %s114_s23, 4  ;;  %s53_s0 = int_to_ptr.vmem [resolvable:$true] %s52_s0 }
  0x15   :  { %v38_v6 = vunpack.c.0.s8 %v37_v2  ;;  %s86_s24 = scalar_lea.vmem %s53_s0, 64  ;;  %p91_p9 = scmp.lt.s32.totalorder %s53_s0, %s53_s0 }
  0x16   :  { %v29_v4 = vsub.s32 0, %v28_v3  ;;  %v33_v5 = vsub.s32 1, %v28_v3  ;;  %p87_p8 = scmp.ne.s32.totalorder %s53_s0, %s86_s24  ;;  %p92_p10 = scmp.lt.s32.totalorder %s86_s24, %s86_s24 }
  0x17   :  { %v41_v10 = vsub.s32 %v38_v6, %v28_v3 }
  0x18   :  { %v30_v8 = vrot.slane %v25_v7, %v29_v4  ;;  %v34_v9 = vrot.slane %v25_v7, %v33_v5  ;;  %p93_p11 = por %p92_p10, %p91_p9 }
  0x1a   :  { %v35_v11 = vcombine.low %v30_v8, %v34_v9  ;;  %p94_p12 = pnand %p93_p11, %p87_p8 }
  0x1c   :  { %v42_v13 = vrot.slane %v35_v11, %v41_v10 }
  0x1e   :  { %v44_v14 = vadd.f32 %v42_v13, %v24_v12 }
  0x20   :  { %45 = vst [vmem:[#allocation5] sm:$0xf] %v44_v14 }
  0x21   :  { %97 = shalt.err (!%p94_p12)
}
  0x22   :  { %s98_s26 = scalar_lea.hbm %s159_s2, 64 }
  0x23   :  { %p99_p13 = scmp.ne.s32.totalorder %s159_s2, %s98_s26  ;;  %p102_p0 = scmp.lt.u32.totalorder %s98_s26, %s159_s2 }
  0x25   :  { %p104_p1 = pnand %p102_p0, %p99_p13 }
  0x27   :  { %107 = shalt.err (!%p104_p1)
}
  0x28   :  { %55 = dma.vmem_to_hbm [thread:$0]  %s53_s0, 64, %s159_s2, [#allocation4]  }
  0x29   :  { %110 = dma.done.wait [#allocation4], 64  }
  0x2a   :  { %111 = vsyncadd [#allocation4], 4294967232 }
  0x2b   :  { %59 = vsyncpa [#allocation3], 1 }
  0x2c   :  { %60 = vsyncpa [#allocation4], 1 }

</bundles_post_ra>
